<compile_context>
chip_gen: v7x
topology: tpu7x:2x2x1
jax: 0.10.0
libtpu: 0.0.40
codegen_flags: <defaults>
</compile_context>

<pallas_src>
import functools

import jax
import jax.numpy as jnp
from jax.experimental import pallas as pl
from jax.experimental.pallas import tpu as pltpu

_LANE = 128       # TPU lane width (class axis padded to this)
_SUBLANE = 8      # sublane granularity for the batch tile
_NEG_BIG = -1e30  # "minus infinity" for padded classes (finite => no NaN risk)


def _round_up(x: int, m: int) -> int:
    return (x + m - 1) // m * m


def _mclr_logistic_kernel(x_ref, wt_ref, b_ref, o_ref):
    """One batch tile: logits = x @ W^T + b ; log_softmax over the class axis."""
    # MXU matmul: bf16 operands, f32 accumulate.
    logits = jnp.dot(
        x_ref[...], wt_ref[...], preferred_element_type=jnp.float32
    )                                                  # [TM, C_PAD] f32
    logits = logits + b_ref[...]                       # bias (padded lanes = -1e30)

    # Numerically-stable log_softmax (f32 elementwise path).
    m = jnp.max(logits, axis=-1, keepdims=True)        # [TM, 1]
    shifted = logits - m
    lse = jnp.log(jnp.sum(jnp.exp(shifted), axis=-1, keepdims=True))
    o_ref[...] = (shifted - lse).astype(o_ref.dtype)


def prepare_params(weight, bias):
    """One-time parameter prep (do NOT call per forward step).

    weight: [out_dim, in_dim] (PyTorch nn.Linear convention)
    bias:   [out_dim]
    Returns (wt_pad [in_dim, C_PAD] bf16, b_pad [1, C_PAD] f32, out_dim).
    """
    out_dim, in_dim = weight.shape
    c_pad = _round_up(out_dim, _LANE)

    wt_pad = jnp.zeros((in_dim, c_pad), dtype=jnp.bfloat16)
    wt_pad = wt_pad.at[:, :out_dim].set(weight.T.astype(jnp.bfloat16))

    b_pad = jnp.full((1, c_pad), _NEG_BIG, dtype=jnp.float32)
    b_pad = b_pad.at[0, :out_dim].set(bias.astype(jnp.float32))
    return wt_pad, b_pad, out_dim


def mclr_logistic_forward(x, wt_pad, b_pad, out_dim):
    """Forward pass with pre-prepared (padded / transposed / bf16) params.

    x: [B, ...] any shape, flattened to [B, in_dim].
    Returns [B, out_dim] f32 log-probabilities.
    """
    B = x.shape[0]
    x2d = x.reshape(B, -1).astype(jnp.bfloat16)        # flatten(1) + bf16 MXU input
    in_dim = x2d.shape[1]
    c_pad = wt_pad.shape[1]
    assert wt_pad.shape[0] == in_dim

    # Batch tiling: TM rows per grid step (amortizes per-step overhead, keeps
    # tiles well under the scoped-VMEM limit even on v7x).
    tm = min(512, _round_up(B, _SUBLANE))
    b_pad_rows = _round_up(B, tm)
    if b_pad_rows != B:
        x2d = jnp.pad(x2d, ((0, b_pad_rows - B), (0, 0)))

    grid = (b_pad_rows // tm,)

    out_padded = pl.pallas_call(
        _mclr_logistic_kernel,
        out_shape=jax.ShapeDtypeStruct((b_pad_rows, c_pad), jnp.float32),
        grid=grid,
        in_specs=[
            pl.BlockSpec((tm, in_dim), lambda i: (i, 0)),   # activations: tiled
            pl.BlockSpec((in_dim, c_pad), lambda i: (0, 0)),  # W^T: resident
            pl.BlockSpec((1, c_pad), lambda i: (0, 0)),       # bias: resident
        ],
        out_specs=pl.BlockSpec((tm, c_pad), lambda i: (i, 0)),
        compiler_params=pltpu.CompilerParams(
            dimension_semantics=("parallel",),
        ),
    )(x2d, wt_pad, b_pad)

    # Slice away batch padding and the lane-padded classes.
    return out_padded[:B, :out_dim]


def mclr_logistic(x, weight, bias):
    """Convenience wrapper matching the PyTorch module signature (preps params
    per call; prefer prepare_params() + mclr_logistic_forward() in a loop)."""
    wt_pad, b_pad, out_dim = prepare_params(weight, bias)
    return mclr_logistic_forward(x, wt_pad, b_pad, out_dim)


if __name__ == "__main__":
    # Deterministic synthetic parameters / inputs (MNIST-like shapes, small batch).
    input_dim, output_dim = 784, 10
    B = 8

    key = jax.random.PRNGKey(0)
    kx, kw, kb = jax.random.split(key, 3)

    # NCHW input, flattened inside the forward (1*28*28 = 784 = input_dim).
    x = jax.random.normal(kx, (B, 1, 28, 28), dtype=jnp.float32)

    # nn.Linear-style init: U(-1/sqrt(fan_in), 1/sqrt(fan_in)).
    bound = 1.0 / (input_dim ** 0.5)
    weight = jax.random.uniform(
        kw, (output_dim, input_dim), minval=-bound, maxval=bound, dtype=jnp.float32
    )
    bias = jax.random.uniform(
        kb, (output_dim,), minval=-bound, maxval=bound, dtype=jnp.float32
    )

    # One-time param prep (transpose / pad / bf16 cast happens once, not per call).
    wt_pad, b_pad, out_dim = prepare_params(weight, bias)

    out = mclr_logistic_forward(x, wt_pad, b_pad, out_dim)
    jax.block_until_ready(out)

    # Sanity check against a pure-JAX f32 reference (loose tolerance: bf16 MXU inputs).
    ref_logits = x.reshape(B, -1) @ weight.T + bias
    ref = jax.nn.log_softmax(ref_logits, axis=1)
    assert out.shape == (B, output_dim)
    assert jnp.allclose(out, ref, atol=2e-2, rtol=2e-2), (
        f"max abs err = {jnp.max(jnp.abs(out - ref))}"
    )

    print("KERNEL_OK")
</pallas_src>

<mosaic_0001>
module attributes {stable_mosaic.version = 11 : i64} {
  func.func @_mclr_logistic_kernel(%arg0: i32, %arg1: memref<8x784xbf16, #tpu.memory_space<vmem>>, %arg2: memref<784x128xbf16, #tpu.memory_space<vmem>>, %arg3: memref<1x128xf32, #tpu.memory_space<vmem>>, %arg4: memref<8x128xf32, #tpu.memory_space<vmem>>) attributes {dimension_semantics = [#tpu.dimension_semantics<parallel>], iteration_bounds = array<i64: 1>, scalar_prefetch = 0 : i64, scratch_operands = 0 : i64, tpu.core_type = #tpu.core_type<tc>, window_params = [{transform_indices = @transform_0, window_bounds = array<i64: 8, 784>}, {pipeline_mode = #tpu.pipeline_mode<synchronous>, transform_indices = @transform_1, window_bounds = array<i64: 784, 128>}, {pipeline_mode = #tpu.pipeline_mode<synchronous>, transform_indices = @transform_2, window_bounds = array<i64: 1, 128>}, {transform_indices = @transform_3, window_bounds = array<i64: 8, 128>}]} {
    %c0 = arith.constant 0 : index
    %c0_0 = arith.constant 0 : index
    %0 = vector.load %arg1[%c0, %c0_0] : memref<8x784xbf16, #tpu.memory_space<vmem>>, vector<8x784xbf16>
    %c0_1 = arith.constant 0 : index
    %c0_2 = arith.constant 0 : index
    %1 = vector.load %arg2[%c0_1, %c0_2] : memref<784x128xbf16, #tpu.memory_space<vmem>>, vector<784x128xbf16>
    %cst = arith.constant dense<0.000000e+00> : vector<8x128xf32>
    %2 = tpu.matmul %0, %1, %cst {dimension_numbers = #tpu.dot_dimension_numbers<[1], [0], [0], [1], [0, 0, 1, 1], [], []>} : vector<8x784xbf16>, vector<784x128xbf16>, vector<8x128xf32> -> vector<8x128xf32>
    %c0_3 = arith.constant 0 : index
    %c0_4 = arith.constant 0 : index
    %3 = vector.load %arg3[%c0_3, %c0_4] : memref<1x128xf32, #tpu.memory_space<vmem>>, vector<1x128xf32>
    %4 = vector.broadcast %3 : vector<1x128xf32> to vector<8x128xf32>
    %5 = arith.addf %2, %4 : vector<8x128xf32>
    %cst_5 = arith.constant dense<0xFF800000> : vector<8xf32>
    %6 = vector.multi_reduction <maximumf>, %5, %cst_5 [1] : vector<8x128xf32> to vector<8xf32>
    %7 = vector.shape_cast %6 : vector<8xf32> to vector<8x1xf32>
    %8 = vector.broadcast %7 : vector<8x1xf32> to vector<8x128xf32>
    %9 = arith.subf %5, %8 : vector<8x128xf32>
    %10 = math.exp %9 : vector<8x128xf32>
    %cst_6 = arith.constant dense<0.000000e+00> : vector<8xf32>
    %11 = vector.multi_reduction <add>, %10, %cst_6 [1] : vector<8x128xf32> to vector<8xf32>
    %12 = vector.shape_cast %11 : vector<8xf32> to vector<8x1xf32>
    %13 = math.log %12 : vector<8x1xf32>
    %14 = vector.broadcast %13 : vector<8x1xf32> to vector<8x128xf32>
    %15 = arith.subf %9, %14 : vector<8x128xf32>
    %c0_7 = arith.constant 0 : index
    %c0_8 = arith.constant 0 : index
    %16 = vector.load %arg4[%c0_7, %c0_8] : memref<8x128xf32, #tpu.memory_space<vmem>>, vector<8x128xf32>
    tpu.vector_store %arg4[%c0_7, %c0_8], %15 {strides = array<i32>} : memref<8x128xf32, #tpu.memory_space<vmem>>, vector<8x128xf32>,
    return
  }
  func.func @transform_0(%arg0: i32) -> (i32, i32) {
    %c0_i32 = arith.constant 0 : i32
    %c0_i32_0 = arith.constant 0 : i32
    return %arg0, %c0_i32 : i32, i32
  }
  func.func @transform_1(%arg0: i32) -> (i32, i32) {
    %c0_i32 = arith.constant 0 : i32
    %c0_i32_0 = arith.constant 0 : i32
    %c0_i32_1 = arith.constant 0 : i32
    return %c0_i32, %c0_i32_0 : i32, i32
  }
  func.func @transform_2(%arg0: i32) -> (i32, i32) {
    %c0_i32 = arith.constant 0 : i32
    %c0_i32_0 = arith.constant 0 : i32
    %c0_i32_1 = arith.constant 0 : i32
    return %c0_i32, %c0_i32_0 : i32, i32
  }
  func.func @transform_3(%arg0: i32) -> (i32, i32) {
    %c0_i32 = arith.constant 0 : i32
    %c0_i32_0 = arith.constant 0 : i32
    return %arg0, %c0_i32 : i32, i32
  }
}

</mosaic_0001>

<bundles_post_ra>
// kernel: tpu_custom_call.1
= control target key start
LH: loop header
LB: loop body
LE: loop exit
PB: predicated region body
PF: predicated region fallthrough
CT: control target
= control target key end

     0   :  { %8 = vsyncpa [#allocation3], 0  ;;  %s1004_s0 = inlined_call_operand.hbm [shape: bf16[8,784], index: 0, kind: input, shape index: {}]   ;;  %s1005_s1 = inlined_call_operand.hbm [shape: bf16[784,128], index: 1, kind: input, shape index: {}]   ;;  %s1006_s2 = inlined_call_operand.vmem [shape: f32[1,128], index: 2, kind: input, shape index: {}]   ;;  %s1007_s3 = inlined_call_operand.hbm [shape: f32[8,128], index: 3, kind: output, shape index: {}]  }
   0x1   :  { %9 = vsyncpa [#allocation6], 0 }
   0x2   :  { %10 = vsyncpa [#allocation4], 0  ;;  %s931_s12 = smov [#allocation2]   ;;  %s932_s14 = smov [#allocation5]  }
   0x3   :  { %s17_s13 = sshll.u32 %s931_s12, 4  ;;  %s26_s15 = sshll.u32 %s932_s14, 4  ;;  %s18_s13 = int_to_ptr.vmem [resolvable:$true] %s17_s13  ;;  %s958_s15 = int_to_ptr.vmem [resolvable:$true] %s26_s15 }
   0x4   :  { %s859_s18 = scalar_lea.hbm %s1004_s0, 448 }
   0x5   :  { %p860_p0 = scmp.ne.s32.totalorder %s1004_s0, %s859_s18  ;;  %p863_p1 = scmp.lt.u32.totalorder %s859_s18, %s1004_s0 }
   0x7   :  { %p865_p2 = pnand %p863_p1, %p860_p0 }
   0x9   :  { %868 = shalt.err (!%p865_p2)
}
   0xa   :  { %s869_s23 = scalar_lea.vmem %s18_s13, 448  ;;  %p874_p4 = scmp.lt.s32.totalorder %s18_s13, %s18_s13 }
   0xb   :  { %p870_p3 = scmp.ne.s32.totalorder %s18_s13, %s869_s23  ;;  %p875_p5 = scmp.lt.s32.totalorder %s869_s23, %s869_s23 }
   0xd   :  { %p876_p6 = por %p875_p5, %p874_p4 }
   0xf   :  { %p877_p7 = pnand %p876_p6, %p870_p3 }
  0x11   :  { %880 = shalt.err (!%p877_p7)
}
  0x12   :  { %20 = dma.hbm_to_vmem [thread:$0]  %s1004_s0, 448, %s18_s13, [#allocation3]  }
  0x13   :  { %s881_s28 = scalar_lea.hbm %s1005_s1, 6272 }
  0x14   :  { %p882_p8 = scmp.ne.s32.totalorder %s1005_s1, %s881_s28  ;;  %p885_p9 = scmp.lt.u32.totalorder %s881_s28, %s1005_s1 }
  0x16   :  { %p887_p10 = pnand %p885_p9, %p882_p8 }
  0x18   :  { %890 = shalt.err (!%p887_p10)
}
  0x19   :  { %s891_s6 = scalar_lea.vmem %s958_s15, 6272  ;;  %p896_p12 = scmp.lt.s32.totalorder %s958_s15, %s958_s15 }
  0x1a   :  { %p892_p11 = scmp.ne.s32.totalorder %s958_s15, %s891_s6  ;;  %p897_p13 = scmp.lt.s32.totalorder %s891_s6, %s891_s6 }
  0x1c   :  { %p898_p0 = por %p897_p13, %p896_p12 }
  0x1e   :  { %p899_p1 = pnand %p898_p0, %p892_p11 }
  0x20   :  { %902 = shalt.err (!%p899_p1)
}
  0x21   :  { %s933_s0 = smov 64   ;;  %s934_s7 = smov 4  }
  0x22   :  { %32 = dma.hbm_to_vmem [thread:$0]  %s1005_s1, 6272, %s958_s15, [#allocation6], %s933_s0, %s933_s0, %s934_s7  }
  0x23   :  { %925 = dma.done.wait [#allocation3], 448  }
  0x24   :  { %926 = vsyncadd [#allocation3], 4294966848 }
  0x25   :  { %927 = dma.done.wait [#allocation6], 6272  }
  0x26   :  { %928 = vsyncadd [#allocation6], 4294961024  ;;  %v799_v0 = vld [vmem:[#allocation5 + $0x40] sm:$0xff]   ;;  %v803_v4 = vld [vmem:[#allocation5 + $0x48] sm:$0xff]   ;;  %v935_v43 = vmov 0.0   ;;  %vm936_vm0 = vmmov 0  }
  0x27   :  { %v800_v1 = vld [vmem:[#allocation5] sm:$0xff]   ;;  %718 = vmatprep.subr.bf16.mxu0 %v799_v0  ;;  %v804_v5 = vld [vmem:[#allocation5 + $0x8] sm:$0xff]   ;;  %v807_v8 = vld [vmem:[#allocation5 + $0x50] sm:$0xff]   ;;  %vm469_vm1 = vcmask 130048  }
  0x28   :  { %v801_v2 = vld [vmem:[#allocation5 + $0xc0] sm:$0xff]   ;;  %719 = vmatpush3.bf16.msra.mxu0 %v800_v1  ;;  %v805_v6 = vld [vmem:[#allocation5 + $0xc8] sm:$0xff]   ;;  %v808_v9 = vld [vmem:[#allocation5 + $0x10] sm:$0xff]  }
  0x29   :  { %v802_v3 = vld [vmem:[#allocation5 + $0x80] sm:$0xff]   ;;  %740 = vmatprep.subr.bf16.mxu1 %v801_v2  ;;  %720 = vmatprep.subr.bf16.mxu0 %v803_v4  ;;  %v806_v7 = vld [vmem:[#allocation5 + $0x88] sm:$0xff]   ;;  %v809_v10 = vld [vmem:[#allocation5 + $0xd0] sm:$0xff]  }
  0x2a   :  { %741 = vmatpush3.bf16.msra.mxu1 %v802_v3  ;;  %v810_v11 = vld [vmem:[#allocation5 + $0x90] sm:$0xff]   ;;  %v811_v12 = vld [vmem:[#allocation5 + $0x58] sm:$0xff]   ;;  %v815_v16 = vld [vmem:[#allocation5 + $0x60] sm:$0xff]  }
  0x2b   :  { %742 = vmatprep.subr.bf16.mxu1 %v805_v6  ;;  %v812_v13 = vld [vmem:[#allocation5 + $0x18] sm:$0xff]   ;;  %v816_v17 = vld [vmem:[#allocation5 + $0x20] sm:$0xff]   ;;  %v819_v20 = vld [vmem:[#allocation5 + $0x68] sm:$0xff]  }
  0x2c   :  { %721 = vmatpush3.bf16.msra.mxu0 %v804_v5  ;;  %v813_v14 = vld [vmem:[#allocation5 + $0xd8] sm:$0xff]   ;;  %v817_v18 = vld [vmem:[#allocation5 + $0xe0] sm:$0xff]   ;;  %v820_v21 = vld [vmem:[#allocation5 + $0x28] sm:$0xff]  }
  0x2d   :  { %722 = vmatprep.subr.bf16.mxu0 %v807_v8  ;;  %v814_v15 = vld [vmem:[#allocation5 + $0x98] sm:$0xff]   ;;  %v818_v19 = vld [vmem:[#allocation5 + $0xa0] sm:$0xff]   ;;  %v821_v22 = vld [vmem:[#allocation5 + $0xe8] sm:$0xff]  }
  0x2e   :  { %743 = vmatpush3.bf16.msra.mxu1 %v806_v7  ;;  %v822_v23 = vld [vmem:[#allocation5 + $0xa8] sm:$0xff]   ;;  %v823_v24 = vld [vmem:[#allocation5 + $0x70] sm:$0xff]   ;;  %v827_v28 = vld [vmem:[#allocation5 + $0x78] sm:$0xff]  }
  0x2f   :  { %744 = vmatprep.subr.bf16.mxu1 %v809_v10  ;;  %v824_v25 = vld [vmem:[#allocation5 + $0x30] sm:$0xff]   ;;  %v828_v29 = vld [vmem:[#allocation5 + $0x38] sm:$0xff]   ;;  %v42_v31 = vld [vmem:[#allocation2] sm:$0xff] }
  0x30   :  { %723 = vmatpush3.bf16.msra.mxu0 %v808_v9  ;;  %v825_v26 = vld [vmem:[#allocation5 + $0xf0] sm:$0xff]   ;;  %v829_v30 = vld [vmem:[#allocation5 + $0xf8] sm:$0xff]   ;;  %v661_v32 = vcombine.low %v42_v31, %v42_v31  ;;  %v662_v33 = vcombine.high %v42_v31, %v42_v31  ;;  %v833_v35 = vld [vmem:[#allocation5 + $0x140] sm:$0xff]  }
  0x31   :  { %724 = vmatprep.subr.bf16.mxu0 %v811_v12  ;;  %v826_v27 = vld [vmem:[#allocation5 + $0xb0] sm:$0xff]   ;;  %v832_v34 = vld [vmem:[#allocation5 + $0xb8] sm:$0xff]   ;;  %v836_v39 = vld [vmem:[#allocation5 + $0x100] sm:$0xff]  }
  0x32   :  { %745 = vmatpush3.bf16.msra.mxu1 %v810_v11  ;;  %v43_v36 = vld [vmem:[#allocation2 + $0x8] sm:$0xff]  ;;  %505 = vmatprep.mubr.bf16.mxu0 %v662_v33  ;;  %v841_v45 = vld [vmem:[#allocation5 + $0x158] sm:$0xff]   ;;  %v843_v47 = vld [vmem:[#allocation5 + $0x160] sm:$0xff]  }
  0x33   :  { %746 = vmatprep.subr.bf16.mxu1 %v813_v14  ;;  %v663_v37 = vcombine.low %v43_v36, %v43_v36  ;;  %v664_v38 = vcombine.high %v43_v36, %v43_v36  ;;  %v837_v40 = vld [vmem:[#allocation5 + $0x148] sm:$0xff]   ;;  %v839_v42 = vld [vmem:[#allocation5 + $0x150] sm:$0xff]   ;;  %v842_v46 = vld [vmem:[#allocation5 + $0x118] sm:$0xff]  }
  0x34   :  { %725 = vmatpush3.bf16.msra.mxu0 %v812_v13  ;;  %v838_v41 = vld [vmem:[#allocation5 + $0x108] sm:$0xff]   ;;  %v840_v44 = vld [vmem:[#allocation5 + $0x110] sm:$0xff]   ;;  %v844_v48 = vld [vmem:[#allocation5 + $0x120] sm:$0xff]  }
  0x35   :  { %726 = vmatprep.subr.bf16.mxu0 %v815_v16  ;;  %545 = vmatprep.mubr.bf16.mxu1 %v664_v38  ;;  %v845_v49 = vld [vmem:[#allocation5 + $0x168] sm:$0xff]   ;;  %v851_v50 = vld [vmem:[#allocation5 + $0x180] sm:$0xff]   ;;  %v44_v51 = vld [vmem:[#allocation2 + $0x10] sm:$0xff] }
  0x36   :  { %747 = vmatpush3.bf16.msra.mxu1 %v814_v15  ;;  %v666_v52 = vcombine.high %v44_v51, %v44_v51  ;;  %v854_v53 = vld [vmem:[#allocation2 + $0x18] ss:$0 sps:$4 sm:$0xff]   ;;  %v846_v54 = vld [vmem:[#allocation5 + $0x128] sm:$0xff]   ;;  %v847_v55 = vld [vmem:[#allocation5 + $0x170] sm:$0xff]   ;;  %v665_v59 = vcombine.low %v44_v51, %v44_v51 }
  0x37   :  { %748 = vmatprep.subr.bf16.mxu1 %v817_v18  ;;  %v848_v56 = vld [vmem:[#allocation5 + $0x130] sm:$0xff]   ;;  %v849_v57 = vld [vmem:[#allocation5 + $0x178] sm:$0xff]   ;;  %v660_v61 = vld [vmem:[%s1006_s2] ss:$0 sm:$0xff]  ;;  %s937_s2 = smov [#allocation7]  }
  0x38   :  { %727 = vmatpush3.bf16.msra.mxu0 %v816_v17  ;;  %v850_v58 = vld [vmem:[#allocation5 + $0x138] sm:$0xff]   ;;  %s650_s11 = sshll.u32 %s937_s2, 4  ;;  %s651_s11 = int_to_ptr.vmem [resolvable:$true] %s650_s11 }
  0x39   :  { %728 = vmatprep.subr.bf16.mxu0 %v819_v20  ;;  %s903_s12 = scalar_lea.vmem %s651_s11, 128  ;;  %p908_p3 = scmp.lt.s32.totalorder %s651_s11, %s651_s11 }
  0x3a   :  { %749 = vmatpush3.bf16.msra.mxu1 %v818_v19  ;;  %p904_p2 = scmp.ne.s32.totalorder %s651_s11, %s903_s12  ;;  %p909_p4 = scmp.lt.s32.totalorder %s903_s12, %s903_s12 }
  0x3b   :  { %750 = vmatprep.subr.bf16.mxu1 %v821_v22 }
  0x3c   :  { %729 = vmatpush3.bf16.msra.mxu0 %v820_v21  ;;  %p910_p5 = por %p909_p4, %p908_p3 }
  0x3d   :  { %730 = vmatprep.subr.bf16.mxu0 %v823_v24 }
  0x3e   :  { %751 = vmatpush3.bf16.msra.mxu1 %v822_v23  ;;  %p911_p6 = pnand %p910_p5, %p904_p2 }
  0x3f   :  { %752 = vmatprep.subr.bf16.mxu1 %v825_v26 }
  0x40   :  { %731 = vmatpush3.bf16.msra.mxu0 %v824_v25 }
  0x41   :  { %732 = vmatprep.subr.bf16.mxu0 %v827_v28 }
  0x42   :  { %753 = vmatpush3.bf16.msra.mxu1 %v826_v27 }
  0x43   :  { %754 = vmatprep.subr.bf16.mxu1 %v829_v30 }
  0x44   :  { %733 = vmatpush3.bf16.msra.mxu0 %v828_v29 }
  0x45   :  { %762 = vmatprep.subr.bf16.mxu0 %v833_v35 }
  0x46   :  { %755 = vmatpush3.bf16.msra.mxu1 %v832_v34 }
  0x47   :  { %506 = vmatmul.mubr.bf16.vlgmr.msra.gmra.mrb[0].mxu0 %v661_v32  ;;  %786 = vmatprep.subr.bf16.mxu1 %v935_v43 }
  0x48   :  { %763 = vmatpush3.bf16.msra.mxu0 %v836_v39  ;;  %585 = vmatprep.mubr.bf16.mxu0 %v666_v52 }
  0x49   :  { %546 = vmatmul.mubr.bf16.vlgmr.msra.gmra.mrb[0].mxu1 %v663_v37  ;;  %764 = vmatprep.subr.bf16.mxu0 %v837_v40 }
  0x4a   :  { %788 = vmatprep.mubr.msk.bf16.mxu1 %vm936_vm0, %v935_v43  ;;  %787 = vmatpush3.bf16.msra.mxu1 %v851_v50 }
  0x4c   :  { %765 = vmatpush3.bf16.msra.mxu0 %v838_v41 }
  0x4d   :  { %766 = vmatprep.subr.bf16.mxu0 %v839_v42 }
  0x50   :  { %767 = vmatpush3.bf16.msra.mxu0 %v840_v44 }
  0x51   :  { %768 = vmatprep.subr.bf16.mxu0 %v841_v45  ;;  %789 = vmatmul.mubr.msk.bf16.vlgmr.msra.gmra.mrb[4].mxu1 %vm469_vm1, %v854_v53 }
  0x54   :  { %769 = vmatpush3.bf16.msra.mxu0 %v842_v46 }
  0x55   :  { %770 = vmatprep.subr.bf16.mxu0 %v843_v47 }
  0x58   :  { %771 = vmatpush3.bf16.msra.mxu0 %v844_v48 }
  0x59   :  { %772 = vmatprep.subr.bf16.mxu0 %v845_v49 }
  0x5c   :  { %773 = vmatpush3.bf16.msra.mxu0 %v846_v54 }
  0x5d   :  { %774 = vmatprep.subr.bf16.mxu0 %v847_v55 }
  0x60   :  { %775 = vmatpush3.bf16.msra.mxu0 %v848_v56 }
  0x61   :  { %776 = vmatprep.subr.bf16.mxu0 %v849_v57 }
  0x64   :  { %777 = vmatpush3.bf16.msra.mxu0 %v850_v58 }
  0x67   :  { %586 = vmatmul.mubr.bf16.vlgmr.msra.gmra.mrb[4].mxu0 %v665_v59 }
 0x11a   :  { %v734_v60 = vpop.f32.mrb[0].mxu0 }
 0x11b   :  { %v735_v62 = vpop.f32.mrb[1].mxu0 }
 0x11c   :  { %v736_v63 = vadd.f32 %v735_v62, %v734_v60  ;;  %v737_v0 = vpop.f32.mrb[2].mxu0  ;;  %v756_v1 = vpop.f32.mrb[0].mxu1 }
 0x11d   :  { %v738_v2 = vpop.f32.mrb[3].mxu0  ;;  %v757_v3 = vpop.f32.mrb[1].mxu1 }
 0x11e   :  { %v508_v4 = vadd.f32 %v736_v63, %v660_v61  ;;  %v758_v5 = vadd.f32 %v757_v3, %v756_v1  ;;  %v759_v6 = vpop.f32.mrb[2].mxu1 }
 0x11f   :  { %v760_v7 = vpop.f32.mrb[3].mxu1 }
 0x120   :  { %v548_v8 = vadd.f32 %v758_v5, %v508_v4 }
 0x124   :  { %v627_v9 = vpop.f32.mrb[4].mxu1 }
 0x125   :  { %v790_v10 = vpop.f32.mrb[5].mxu1 }
 0x126   :  { %v630_v11 = vpop.f32.mrb[6].mxu1 }
 0x127   :  { %v791_v12 = vpop.f32.mrb[7].mxu1 }
 0x13a   :  { %v778_v13 = vpop.f32.mrb[4].mxu0 }
 0x13b   :  { %v779_v14 = vpop.f32.mrb[5].mxu0 }
 0x13c   :  { %v780_v15 = vadd.f32 %v779_v14, %v778_v13  ;;  %v781_v16 = vpop.f32.mrb[6].mxu0 }
 0x13d   :  { %v782_v17 = vpop.f32.mrb[7].mxu0 }
 0x13e   :  { %v588_v18 = vadd.f32 %v780_v15, %v548_v8 }
 0x140   :  { %v628_v19 = vadd.f32 %v627_v9, %v588_v18 }
 0x142   :  { %633 = vmax.xlane.f32.xlu0 %v628_v19 }
 0x1cf   :  { %v634_v20 = vpop.xlane.xlu0 %633 }
 0x1d0   :  { %v635_v21 = vsub.f32 %v628_v19, %v634_v20 }
 0x1d2   :  { %v636_v22 = vmul.f32 1.442695, %v635_v21 }
 0x1d4   :  { %855 = vpow2.f32 %v636_v22 }
 0x1de   :  { %v856_v23 = vpop.eup %855 }
 0x1df   :  { %638 = vadd.xlane.f32.xlu0 %v856_v23 }
 0x26c   :  { %v639_v24 = vpop.xlane.xlu0 %638 }
 0x26d   :  { %857 = vlog2.f32 %v639_v24 }
 0x277   :  { %v858_v25 = vpop.eup %857 }
 0x278   :  { %v641_v26 = vmul.f32 0.6931472, %v858_v25 }
 0x27a   :  { %v642_v27 = vsub.f32 %v635_v21, %v641_v26 }
 0x27c   :  { %643 = vst [vmem:[#allocation7] sm:$0xff] %v642_v27 }
 0x27d   :  { %914 = shalt.err (!%p911_p6)
}
 0x27e   :  { %s915_s15 = scalar_lea.hbm %s1007_s3, 128 }
 0x27f   :  { %p916_p7 = scmp.ne.s32.totalorder %s1007_s3, %s915_s15  ;;  %p919_p8 = scmp.lt.u32.totalorder %s915_s15, %s1007_s3 }
 0x281   :  { %p921_p9 = pnand %p919_p8, %p916_p7 }
 0x283   :  { %924 = shalt.err (!%p921_p9)
}
 0x284   :  { %653 = dma.vmem_to_hbm [thread:$0]  %s651_s11, 128, %s1007_s3, [#allocation4]  }
 0x285   :  { %929 = dma.done.wait [#allocation4], 128  }
 0x286   :  { %930 = vsyncadd [#allocation4], 4294967168 }
 0x287   :  { %657 = vsyncpa [#allocation3], 1 }
 0x288   :  { %658 = vsyncpa [#allocation6], 1 }
 0x289   :  { %659 = vsyncpa [#allocation4], 1 }

</bundles_post_ra>
